<compile_context>
chip_gen: v7x
topology: tpu7x:2x2x1
jax: 0.10.0
libtpu: 0.0.40
codegen_flags: <defaults>
</compile_context>

<pallas_src>
import jax
import jax.numpy as jnp
from jax.experimental import pallas as pl
from jax.experimental.pallas import tpu as pltpu


def _mse_partial_kernel(yp_ref, yt_ref, part_ref):
    """Per-tile partial sum of squared error.

    Each grid step owns its own output element, so there is no cross-step
    dependency and the grid axis can be marked "parallel".
    """
    diff = yp_ref[...].astype(jnp.float32) - yt_ref[...].astype(jnp.float32)
    part_ref[0, 0] = jnp.sum(diff * diff)


def _round_up(x: int, m: int) -> int:
    return ((x + m - 1) // m) * m


def mse_forward(y_pred: jax.Array, y_true: jax.Array, *, tile_rows: int | None = None) -> jax.Array:
    """Pallas MSE: (y_pred - y_true).pow(2).sum() / y_true.shape[1]."""
    assert y_pred.shape == y_true.shape and y_pred.ndim == 2
    n, d = y_true.shape

    itemsize = max(jnp.dtype(y_pred.dtype).itemsize, jnp.dtype(y_true.dtype).itemsize)
    bytes_per_row = max(d * itemsize, 1)

    if tile_rows is None:
        # Memory-bound kernel: make each grid step move megabytes.  Target
        # ~4 MiB per input tile; with 2 inputs x 2 pipeline buffers that is
        # ~16 MiB resident, comfortably inside the smallest VMEM (v7x: 64 MiB).
        target_tile_bytes = 4 * 1024 * 1024
        tile_rows = max(8, (target_tile_bytes // bytes_per_row) // 8 * 8)
        tile_rows = min(tile_rows, 4096)
        # Do not make the tile bigger than the (row-rounded) input itself:
        tile_rows = min(tile_rows, _round_up(n, 8))
    tile_rows = max(8, _round_up(int(tile_rows), 8))

    # Zero-pad the batch dim to a multiple of tile_rows (zeros add 0 to the sum).
    n_pad = _round_up(n, tile_rows)
    if n_pad != n:
        pad = ((0, n_pad - n), (0, 0))
        y_pred = jnp.pad(y_pred, pad)
        y_true = jnp.pad(y_true, pad)

    num_tiles = n_pad // tile_rows
    tile_bytes = tile_rows * d * itemsize
    # 2 inputs x 2 pipeline buffers + headroom; capped so it is valid on every
    # generation (v5e/v6e: 128 MiB physical, v7x: 64 MiB per TensorCore).
    vmem_limit = int(min(56 * 1024 * 1024,
                         max(32 * 1024 * 1024, 4 * tile_bytes + (2 << 20))))

    partials = pl.pallas_call(
        _mse_partial_kernel,
        out_shape=jax.ShapeDtypeStruct((num_tiles, 1), jnp.float32),
        grid_spec=pltpu.PrefetchScalarGridSpec(
            num_scalar_prefetch=0,
            grid=(num_tiles,),
            in_specs=[
                pl.BlockSpec((tile_rows, d), lambda i: (i, 0)),
                pl.BlockSpec((tile_rows, d), lambda i: (i, 0)),
            ],
            # One independent scalar slot per tile (no resident accumulator).
            out_specs=pl.BlockSpec((1, 1), lambda i: (i, 0), memory_space=pltpu.SMEM),
        ),
        compiler_params=pltpu.CompilerParams(
            dimension_semantics=("parallel",),   # safe: per-tile outputs; lets v7x use both TCs
            vmem_limit_bytes=vmem_limit,
        ),
    )(y_pred, y_true)

    # Tiny final reduction + normalization in plain XLA.
    # NOTE: divides by y_true.shape[1] only (features), exactly as the PyTorch
    # module does -- NOT by n*d like torch.nn.MSELoss(reduction='mean').
    return jnp.sum(partials) / jnp.float32(d)


def mse_reference(y_pred, y_true):
    yp = y_pred.astype(jnp.float32)
    yt = y_true.astype(jnp.float32)
    return jnp.sum((yp - yt) ** 2) / y_true.shape[1]


if __name__ == "__main__":
    key = jax.random.PRNGKey(0)
    k1, k2, k3, k4 = jax.random.split(key, 4)

    # Case 1: small tile-friendly shape -> single grid step (full array as one tile).
    y_pred = jax.random.normal(k1, (16, 128), dtype=jnp.float32)
    y_true = jax.random.normal(k2, (16, 128), dtype=jnp.float32)
    out = jax.block_until_ready(mse_forward(y_pred, y_true))
    ref = mse_reference(y_pred, y_true)
    assert jnp.allclose(out, ref, rtol=1e-5, atol=1e-5), (out, ref)

    # Case 2: odd shape + forced small tile -> exercises padding and the
    # multi-tile "parallel partial sums" path.
    y_pred2 = jax.random.normal(k3, (37, 96), dtype=jnp.float32)
    y_true2 = jax.random.normal(k4, (37, 96), dtype=jnp.float32)
    out2 = jax.block_until_ready(mse_forward(y_pred2, y_true2, tile_rows=8))
    ref2 = mse_reference(y_pred2, y_true2)
    assert jnp.allclose(out2, ref2, rtol=1e-5, atol=1e-5), (out2, ref2)

    print("KERNEL_OK")
</pallas_src>

<mosaic_0001>
module attributes {stable_mosaic.version = 11 : i64} {
  func.func @_mse_partial_kernel(%arg0: i32, %arg1: memref<16x128xf32, #tpu.memory_space<vmem>>, %arg2: memref<16x128xf32, #tpu.memory_space<vmem>>, %arg3: memref<1x1xf32, #tpu.memory_space<smem>>) attributes {dimension_semantics = [#tpu.dimension_semantics<parallel>], iteration_bounds = array<i64: 1>, scalar_prefetch = 0 : i64, scratch_operands = 0 : i64, tpu.core_type = #tpu.core_type<tc>, window_params = [{transform_indices = @transform_0, window_bounds = array<i64: 16, 128>}, {transform_indices = @transform_1, window_bounds = array<i64: 16, 128>}, {transform_indices = @transform_2, window_bounds = array<i64: 1, 1>}]} {
    %c0 = arith.constant 0 : index
    %c0_0 = arith.constant 0 : index
    %0 = vector.load %arg1[%c0, %c0_0] : memref<16x128xf32, #tpu.memory_space<vmem>>, vector<16x128xf32>
    %c0_1 = arith.constant 0 : index
    %c0_2 = arith.constant 0 : index
    %1 = vector.load %arg2[%c0_1, %c0_2] : memref<16x128xf32, #tpu.memory_space<vmem>>, vector<16x128xf32>
    %2 = arith.subf %0, %1 : vector<16x128xf32>
    %3 = arith.mulf %2, %2 : vector<16x128xf32>
    %4 = vector.shape_cast %3 : vector<16x128xf32> to vector<1x16x128xf32>
    %cst = arith.constant dense<0.000000e+00> : vector<1xf32>
    %5 = vector.multi_reduction <add>, %4, %cst [1, 2] : vector<1x16x128xf32> to vector<1xf32>
    %6 = vector.shape_cast %5 : vector<1xf32> to vector<1x1x1xf32>
    %7 = vector.extract %6[0, 0, 0] : f32 from vector<1x1x1xf32>
    %c0_3 = arith.constant 0 : index
    %c0_4 = arith.constant 0 : index
    %8 = memref.load %arg3[%c0_3, %c0_4] : memref<1x1xf32, #tpu.memory_space<smem>>
    memref.store %7, %arg3[%c0_3, %c0_4] : memref<1x1xf32, #tpu.memory_space<smem>>
    return
  }
  func.func @transform_0(%arg0: i32) -> (i32, i32) {
    %c0_i32 = arith.constant 0 : i32
    %c0_i32_0 = arith.constant 0 : i32
    return %arg0, %c0_i32 : i32, i32
  }
  func.func @transform_1(%arg0: i32) -> (i32, i32) {
    %c0_i32 = arith.constant 0 : i32
    %c0_i32_0 = arith.constant 0 : i32
    return %arg0, %c0_i32 : i32, i32
  }
  func.func @transform_2(%arg0: i32) -> (i32, i32) {
    %c0_i32 = arith.constant 0 : i32
    %c0_i32_0 = arith.constant 0 : i32
    return %arg0, %c0_i32 : i32, i32
  }
}

</mosaic_0001>

<bundles_post_ra>
// kernel: tpu_custom_call.1
= control target key start
LH: loop header
LB: loop body
LE: loop exit
PB: predicated region body
PF: predicated region fallthrough
CT: control target
= control target key end

     0   :  { %7 = vsyncpa [#allocation3], 0  ;;  %s198_s0 = inlined_call_operand.hbm [shape: f32[16,128], index: 0, kind: input, shape index: {}]   ;;  %s199_s1 = inlined_call_operand.hbm [shape: f32[16,128], index: 1, kind: input, shape index: {}]   ;;  %s200_s2 = inlined_call_operand.hbm [shape: f32[1,1], index: 2, kind: output, shape index: {}]  }
   0x1   :  { %8 = vsyncpa [#allocation6], 0 }
   0x2   :  { %9 = vsyncpa [#allocation4], 0  ;;  %s142_s9 = smov [#allocation2]   ;;  %s82_s13 = scalar_lea.hbm %s198_s0, 256 }
   0x3   :  { %s15_s10 = sshll.u32 %s142_s9, 4  ;;  %p83_p0 = scmp.ne.s32.totalorder %s198_s0, %s82_s13  ;;  %s16_s10 = int_to_ptr.vmem [resolvable:$true] %s15_s10 }
   0x4   :  { %p86_p1 = scmp.lt.u32.totalorder %s82_s13, %s198_s0 }
   0x6   :  { %p88_p2 = pnand %p86_p1, %p83_p0 }
   0x8   :  { %91 = shalt.err (!%p88_p2)
}
   0x9   :  { %s92_s18 = scalar_lea.vmem %s16_s10, 256  ;;  %p97_p4 = scmp.lt.s32.totalorder %s16_s10, %s16_s10 }
   0xa   :  { %p93_p3 = scmp.ne.s32.totalorder %s16_s10, %s92_s18  ;;  %p98_p5 = scmp.lt.s32.totalorder %s92_s18, %s92_s18 }
   0xc   :  { %p99_p6 = por %p98_p5, %p97_p4 }
   0xe   :  { %p100_p7 = pnand %p99_p6, %p93_p3 }
  0x10   :  { %103 = shalt.err (!%p100_p7)
}
  0x11   :  { %s143_s19 = smov 128   ;;  %s144_s20 = smov 8  }
  0x12   :  { %21 = dma.hbm_to_vmem [thread:$0]  %s198_s0, 256, %s16_s10, [#allocation3], %s143_s19, %s143_s19, %s144_s20  }
  0x13   :  { %s145_s23 = smov [#allocation5]   ;;  %s104_s27 = scalar_lea.hbm %s199_s1, 256 }
  0x14   :  { %s27_s24 = sshll.u32 %s145_s23, 4  ;;  %p105_p8 = scmp.ne.s32.totalorder %s199_s1, %s104_s27  ;;  %s28_s24 = int_to_ptr.vmem [resolvable:$true] %s27_s24 }
  0x15   :  { %p108_p9 = scmp.lt.u32.totalorder %s104_s27, %s199_s1 }
  0x17   :  { %p110_p10 = pnand %p108_p9, %p105_p8 }
  0x19   :  { %113 = shalt.err (!%p110_p10)
}
  0x1a   :  { %s114_s4 = scalar_lea.vmem %s28_s24, 256  ;;  %p119_p12 = scmp.lt.s32.totalorder %s28_s24, %s28_s24 }
  0x1b   :  { %p115_p11 = scmp.ne.s32.totalorder %s28_s24, %s114_s4  ;;  %p120_p13 = scmp.lt.s32.totalorder %s114_s4, %s114_s4 }
  0x1d   :  { %p121_p0 = por %p120_p13, %p119_p12 }
  0x1f   :  { %p122_p1 = pnand %p121_p0, %p115_p11 }
  0x21   :  { %125 = shalt.err (!%p122_p1)
}
  0x22   :  { %33 = dma.hbm_to_vmem [thread:$0]  %s199_s1, 256, %s28_s24, [#allocation6], %s143_s19, %s143_s19, %s144_s20  }
  0x23   :  { %136 = dma.done.wait [#allocation3], 256  }
  0x24   :  { %137 = vsyncadd [#allocation3], 4294967040 }
  0x25   :  { %138 = dma.done.wait [#allocation6], 256  }
  0x26   :  { %139 = vsyncadd [#allocation6], 4294967040  ;;  %v40_v0 = vld [vmem:[#allocation2] sm:$0xff]  ;;  %v41_v1 = vld [vmem:[#allocation2 + $0x8] sm:$0xff]  ;;  %s126_s8 = scalar_lea.hbm %s200_s2, 16 }
  0x27   :  { %v42_v2 = vld [vmem:[#allocation5] sm:$0xff]  ;;  %v43_v3 = vld [vmem:[#allocation5 + $0x8] sm:$0xff]  ;;  %p127_p2 = scmp.ne.s32.totalorder %s200_s2, %s126_s8  ;;  %p130_p3 = scmp.lt.u32.totalorder %s126_s8, %s200_s2 }
  0x28   :  { %v44_v4 = vsub.f32 %v40_v0, %v42_v2  ;;  %v45_v5 = vsub.f32 %v41_v1, %v43_v3 }
  0x29   :  { %p132_p4 = pnand %p130_p3, %p127_p2 }
  0x2a   :  { %v46_v6 = vmul.f32 %v44_v4, %v44_v4  ;;  %v47_v7 = vmul.f32 %v45_v5, %v45_v5 }
  0x2c   :  { %v48_v8 = vadd.f32 %v47_v7, %v46_v6 }
  0x2e   :  { %49 = vadd.xlane.f32.xlu0 %v48_v8 }
  0xbb   :  { %v50_v9 = vpop.xlane.xlu0 %49 }
  0xbc   :  { %v51_v10 = vrot.slane %v50_v9, 4 }
  0xbe   :  { %v52_v11 = vadd.f32 %v51_v10, %v50_v9 }
  0xc0   :  { %v53_v12 = vrot.slane %v52_v11, 2 }
  0xc2   :  { %v54_v13 = vadd.f32 %v53_v12, %v52_v11 }
  0xc4   :  { %v55_v14 = vrot.slane %v54_v13, 1 }
  0xc6   :  { %v56_v15 = vadd.f32 %v55_v14, %v54_v13 }
  0xc8   :  { %75 = vpush %v56_v15 }
  0xf9   :  { %s76_s1 = spop %75 }
  0xfa   :  { %59 = sst [smem:[#allocation7]] %s76_s1 }
  0xfb   :  { %135 = shalt.err (!%p132_p4)
}
  0xfc   :  { %s146_s13 = smov [#allocation7]  }
  0xfd   :  { %67 = dma.smem_to_hbm %s146_s13, 16, %s200_s2, [#allocation4]  }
  0xfe   :  { %140 = dma.done.wait [#allocation4], 16  }
  0xff   :  { %141 = vsyncadd [#allocation4], 4294967280 }
 0x100   :  { %71 = sfence }
 0x101   :  { %72 = vsyncpa [#allocation3], 1 }
 0x102   :  { %73 = vsyncpa [#allocation6], 1 }
 0x103   :  { %74 = vsyncpa [#allocation4], 1 }

</bundles_post_ra>
